<compile_context>
chip_gen: v7x
topology: tpu7x:2x2x1
jax: 0.10.0
libtpu: 0.0.40
codegen_flags: <defaults>
</compile_context>

<pallas_src>
import functools

import jax
import jax.numpy as jnp
import numpy as np
from jax.experimental import pallas as pl
from jax.experimental.pallas import tpu as pltpu

SIGMA = 0.05
LAM1 = 1.0 / SIGMA
LAM2 = 1.0 / SIGMA
WIDTH = 50          # logical hidden width (as in the PyTorch module)
WPAD = 64           # sublane-padded hidden width (50 -> 64, 8-multiple)
MAX_TILE_N = 1024   # cap on batch tile (lane axis)


def _round_up(a, b):
    return ((a + b - 1) // b) * b


def _pinn_kernel(x_ref, w1_ref, b1_ref, w2_ref, b2_ref, w3_ref, b3_ref, o_ref,
                 *, lam1, lam2, n_rows, tile_n):
    x = x_ref[...]            # (1, T)      batch on lanes
    w1 = w1_ref[...]          # (Wp, 1)     torch W1 as a column
    b1 = b1_ref[...]          # (Wp, 1)
    w2 = w2_ref[...]          # (Wp, Wp)    torch W2 (out x in), zero padded
    b2 = b2_ref[...]          # (Wp, 1)
    w3 = w3_ref[...]          # (Wp, 1)     torch W3 as a column
    b3 = b3_ref[...]          # (1, 1)

    # Hoisted constant (computed once per tile).
    w1_sq = w1 * w1

    # ---- layer 1: Linear(1, W) + Tanh (width on sublanes, batch on lanes) ----
    z1 = w1 * x + b1                          # (Wp, T)
    h1 = jnp.tanh(z1)
    s1 = 1.0 - h1 * h1                        # tanh'
    h1p = s1 * w1                             # d h1 / dx
    h1pp = -2.0 * h1 * s1 * w1_sq             # d^2 h1 / dx^2

    # ---- layer 2: three MXU dots (no concat copies), f32 accumulate ----
    z2 = jnp.dot(w2, h1, preferred_element_type=jnp.float32) + b2     # (Wp, T)
    z2p = jnp.dot(w2, h1p, preferred_element_type=jnp.float32)
    z2pp = jnp.dot(w2, h1pp, preferred_element_type=jnp.float32)
    h2 = jnp.tanh(z2)
    s2 = 1.0 - h2 * h2
    h2p = s2 * z2p
    h2pp = -2.0 * h2 * h2p * z2p + s2 * z2pp

    # ---- layer 3: VPU broadcast-mul + XLU sublane reductions (no MXU) ----
    u_xx = jnp.sum(w3 * h2pp, axis=0, keepdims=True)                  # (1, T)
    u = jnp.sum(w3 * h2, axis=0, keepdims=True) + b3                  # (1, T)

    # Interior rows (global index < N-2) -> u_xx*lam1*0.01, boundary -> u*lam2.
    col = pl.program_id(0) * tile_n + jax.lax.broadcasted_iota(
        jnp.int32, (1, tile_n), 1)
    interior = col < (n_rows - 2)
    o_ref[...] = jnp.where(interior, u_xx * (lam1 * 0.01), u * lam2)


def _choose_tile(n):
    """Pick a lane-dense batch tile: big enough to amortize per-step overhead,
    but keep >= 2 tiles when the batch allows so v7x's 2 TCs both get work."""
    n128 = _round_up(n, 128)
    if n128 <= 128:
        return 128
    half = _round_up((n128 + 1) // 2, 128)
    return max(128, min(MAX_TILE_N, half))


def poisson_pinn_forward(X, params, *, lam1=LAM1, lam2=LAM2, tile_n=None):
    """X: (N, 1) float32, N >= 2. params: transposed-layout weights (W=50)."""
    N = X.shape[0]
    W = params["w1"].shape[1]
    Wp = WPAD
    f32 = jnp.float32

    if tile_n is None:
        tile_n = _choose_tile(N)
    n_pad = _round_up(N, tile_n)
    num_tiles = n_pad // tile_n

    # Lane-dense input: (1, n_pad); padded columns are discarded after the call.
    x_row = jnp.zeros((1, n_pad), f32).at[0, :N].set(X[:, 0].astype(f32))

    def pad_col(v):  # (1, W) row -> zero-padded (Wp, 1) column
        return jnp.zeros((Wp, 1), f32).at[:W, 0].set(v[0].astype(f32))

    w1c = pad_col(params["w1"])
    b1c = pad_col(params["b1"])
    b2c = pad_col(params["b2"])
    # Kernel computes z2 = W2_torch @ h1; params["w2"] stores W2_torch.T.
    w2k = jnp.zeros((Wp, Wp), f32).at[:W, :W].set(params["w2"].T.astype(f32))
    w3c = pad_col(params["w3"])
    b3k = params["b3"].astype(f32).reshape(1, 1)

    kernel = functools.partial(_pinn_kernel, lam1=float(lam1), lam2=float(lam2),
                               n_rows=N, tile_n=tile_n)

    cost = pl.CostEstimate(
        flops=int(3 * 2 * n_pad * Wp * Wp        # three layer-2 matmuls
                  + 2 * 2 * n_pad * Wp           # two layer-3 reductions
                  + 20 * n_pad * Wp),            # elementwise chain-rule work
        transcendentals=int(2 * n_pad * Wp),
        bytes_accessed=int(4 * (2 * n_pad        # x in + out
                                + Wp * Wp + 5 * Wp + 1)),
    )

    out_lane = pl.pallas_call(
        kernel,
        out_shape=jax.ShapeDtypeStruct((1, n_pad), f32),
        grid=(num_tiles,),
        in_specs=[
            pl.BlockSpec((1, tile_n), lambda i: (0, i)),   # X (lane-dense tile)
            pl.BlockSpec((Wp, 1), lambda i: (0, 0)),       # w1 column
            pl.BlockSpec((Wp, 1), lambda i: (0, 0)),       # b1 column
            pl.BlockSpec((Wp, Wp), lambda i: (0, 0)),      # W2 (torch out x in)
            pl.BlockSpec((Wp, 1), lambda i: (0, 0)),       # b2 column
            pl.BlockSpec((Wp, 1), lambda i: (0, 0)),       # w3 column
            pl.BlockSpec((1, 1), lambda i: (0, 0)),        # b3
        ],
        out_specs=pl.BlockSpec((1, tile_n), lambda i: (0, i)),
        compiler_params=pltpu.CompilerParams(
            dimension_semantics=("parallel",)),
        cost_estimate=cost,
    )(x_row, w1c, b1c, w2k, b2c, w3c, b3k)

    return out_lane[0, :N][:, None]


def init_params(key, width=WIDTH):
    """Deterministic PyTorch-Linear-style init (uniform(-1/sqrt(fan_in), ...))."""
    ks = jax.random.split(key, 6)
    f32 = jnp.float32

    def unif(k, shape, fan_in):
        bound = 1.0 / np.sqrt(fan_in)
        return jax.random.uniform(k, shape, f32, -bound, bound)

    return {
        # stored pre-transposed for "activations @ weight" layout
        "w1": unif(ks[0], (1, width), 1),
        "b1": unif(ks[1], (1, width), 1),
        "w2": unif(ks[2], (width, width), width),   # == torch W2.T
        "b2": unif(ks[3], (1, width), width),
        "w3": unif(ks[4], (1, width), width),       # == torch W3
        "b3": unif(ks[5], (1, 1), width),
    }


# ------------------------ pure-JAX reference (autodiff) ------------------------
def _fnn(params, x):
    h1 = jnp.tanh(x @ params["w1"] + params["b1"])
    h2 = jnp.tanh(h1 @ params["w2"] + params["b2"])
    return h2 @ params["w3"].T + params["b3"]


def reference_forward(X, params, lam1=LAM1, lam2=LAM2):
    x_int = X[:-2]
    x_bd = X[-2:]

    def u_scalar(xs):
        return _fnn(params, xs.reshape(1, 1))[0, 0]

    u_xx = jax.vmap(jax.grad(jax.grad(u_scalar)))(x_int[:, 0])[:, None]
    u_bd = _fnn(params, x_bd)
    return jnp.concatenate([u_xx * lam1 * 0.01, u_bd * lam2], axis=0)


if __name__ == "__main__":
    key = jax.random.PRNGKey(0)
    kp, kx = jax.random.split(key)

    params = init_params(kp, WIDTH)

    # 8 interior collocation points + 2 boundary points, column vector (N, 1).
    N = 10
    X = jax.random.uniform(kx, (N, 1), jnp.float32, -1.0, 1.0)

    out = poisson_pinn_forward(X, params)
    out = jax.block_until_ready(out)

    ref = reference_forward(X, params)
    np.testing.assert_allclose(np.asarray(out), np.asarray(ref),
                               rtol=1e-4, atol=1e-5)

    print("KERNEL_OK")
</pallas_src>

<mosaic_0001>
module attributes {stable_mosaic.version = 11 : i64} {
  func.func @_pinn_kernel(%arg0: i32, %arg1: memref<1x128xf32, #tpu.memory_space<vmem>>, %arg2: memref<64x1xf32, #tpu.memory_space<vmem>>, %arg3: memref<64x1xf32, #tpu.memory_space<vmem>>, %arg4: memref<64x64xf32, #tpu.memory_space<vmem>>, %arg5: memref<64x1xf32, #tpu.memory_space<vmem>>, %arg6: memref<64x1xf32, #tpu.memory_space<vmem>>, %arg7: memref<1x1xf32, #tpu.memory_space<vmem>>, %arg8: memref<1x128xf32, #tpu.memory_space<vmem>>) attributes {dimension_semantics = [#tpu.dimension_semantics<parallel>], iteration_bounds = array<i64: 1>, scalar_prefetch = 0 : i64, scratch_operands = 0 : i64, tpu.core_type = #tpu.core_type<tc>, window_params = [{transform_indices = @transform_0, window_bounds = array<i64: 1, 128>}, {pipeline_mode = #tpu.pipeline_mode<synchronous>, transform_indices = @transform_1, window_bounds = array<i64: 64, 1>}, {pipeline_mode = #tpu.pipeline_mode<synchronous>, transform_indices = @transform_2, window_bounds = array<i64: 64, 1>}, {pipeline_mode = #tpu.pipeline_mode<synchronous>, transform_indices = @transform_3, window_bounds = array<i64: 64, 64>}, {pipeline_mode = #tpu.pipeline_mode<synchronous>, transform_indices = @transform_4, window_bounds = array<i64: 64, 1>}, {pipeline_mode = #tpu.pipeline_mode<synchronous>, transform_indices = @transform_5, window_bounds = array<i64: 64, 1>}, {pipeline_mode = #tpu.pipeline_mode<synchronous>, transform_indices = @transform_6, window_bounds = array<i64: 1, 1>}, {transform_indices = @transform_7, window_bounds = array<i64: 1, 128>}]} {
    %c0 = arith.constant 0 : index
    %c0_0 = arith.constant 0 : index
    %0 = vector.load %arg1[%c0, %c0_0] : memref<1x128xf32, #tpu.memory_space<vmem>>, vector<1x128xf32>
    %c0_1 = arith.constant 0 : index
    %c0_2 = arith.constant 0 : index
    %1 = vector.load %arg2[%c0_1, %c0_2] : memref<64x1xf32, #tpu.memory_space<vmem>>, vector<64x1xf32>
    %c0_3 = arith.constant 0 : index
    %c0_4 = arith.constant 0 : index
    %2 = vector.load %arg3[%c0_3, %c0_4] : memref<64x1xf32, #tpu.memory_space<vmem>>, vector<64x1xf32>
    %c0_5 = arith.constant 0 : index
    %c0_6 = arith.constant 0 : index
    %3 = vector.load %arg4[%c0_5, %c0_6] : memref<64x64xf32, #tpu.memory_space<vmem>>, vector<64x64xf32>
    %c0_7 = arith.constant 0 : index
    %c0_8 = arith.constant 0 : index
    %4 = vector.load %arg5[%c0_7, %c0_8] : memref<64x1xf32, #tpu.memory_space<vmem>>, vector<64x1xf32>
    %c0_9 = arith.constant 0 : index
    %c0_10 = arith.constant 0 : index
    %5 = vector.load %arg6[%c0_9, %c0_10] : memref<64x1xf32, #tpu.memory_space<vmem>>, vector<64x1xf32>
    %c0_11 = arith.constant 0 : index
    %c0_12 = arith.constant 0 : index
    %6 = vector.load %arg7[%c0_11, %c0_12] : memref<1x1xf32, #tpu.memory_space<vmem>>, vector<1x1xf32>
    %7 = arith.mulf %1, %1 : vector<64x1xf32>
    %8 = vector.broadcast %1 : vector<64x1xf32> to vector<64x128xf32>
    %9 = vector.broadcast %0 : vector<1x128xf32> to vector<64x128xf32>
    %10 = arith.mulf %8, %9 : vector<64x128xf32>
    %11 = vector.broadcast %2 : vector<64x1xf32> to vector<64x128xf32>
    %12 = arith.addf %10, %11 : vector<64x128xf32>
    %13 = math.tanh %12 : vector<64x128xf32>
    %14 = arith.mulf %13, %13 : vector<64x128xf32>
    %cst = arith.constant 1.000000e+00 : f32
    %15 = vector.broadcast %cst : f32 to vector<64x128xf32>
    %16 = arith.subf %15, %14 : vector<64x128xf32>
    %17 = vector.broadcast %1 : vector<64x1xf32> to vector<64x128xf32>
    %18 = arith.mulf %16, %17 : vector<64x128xf32>
    %cst_13 = arith.constant -2.000000e+00 : f32
    %19 = vector.broadcast %cst_13 : f32 to vector<64x128xf32>
    %20 = arith.mulf %19, %13 : vector<64x128xf32>
    %21 = arith.mulf %20, %16 : vector<64x128xf32>
    %22 = vector.broadcast %7 : vector<64x1xf32> to vector<64x128xf32>
    %23 = arith.mulf %21, %22 : vector<64x128xf32>
    %cst_14 = arith.constant dense<0.000000e+00> : vector<64x128xf32>
    %24 = tpu.matmul %3, %13, %cst_14 {dimension_numbers = #tpu.dot_dimension_numbers<[1], [0], [0], [1], [0, 0, 1, 1], [], []>} : vector<64x64xf32>, vector<64x128xf32>, vector<64x128xf32> -> vector<64x128xf32>
    %25 = vector.broadcast %4 : vector<64x1xf32> to vector<64x128xf32>
    %26 = arith.addf %24, %25 : vector<64x128xf32>
    %cst_15 = arith.constant dense<0.000000e+00> : vector<64x128xf32>
    %27 = tpu.matmul %3, %18, %cst_15 {dimension_numbers = #tpu.dot_dimension_numbers<[1], [0], [0], [1], [0, 0, 1, 1], [], []>} : vector<64x64xf32>, vector<64x128xf32>, vector<64x128xf32> -> vector<64x128xf32>
    %cst_16 = arith.constant dense<0.000000e+00> : vector<64x128xf32>
    %28 = tpu.matmul %3, %23, %cst_16 {dimension_numbers = #tpu.dot_dimension_numbers<[1], [0], [0], [1], [0, 0, 1, 1], [], []>} : vector<64x64xf32>, vector<64x128xf32>, vector<64x128xf32> -> vector<64x128xf32>
    %29 = math.tanh %26 : vector<64x128xf32>
    %30 = arith.mulf %29, %29 : vector<64x128xf32>
    %cst_17 = arith.constant 1.000000e+00 : f32
    %31 = vector.broadcast %cst_17 : f32 to vector<64x128xf32>
    %32 = arith.subf %31, %30 : vector<64x128xf32>
    %33 = arith.mulf %32, %27 : vector<64x128xf32>
    %cst_18 = arith.constant -2.000000e+00 : f32
    %34 = vector.broadcast %cst_18 : f32 to vector<64x128xf32>
    %35 = arith.mulf %34, %29 : vector<64x128xf32>
    %36 = arith.mulf %35, %33 : vector<64x128xf32>
    %37 = arith.mulf %36, %27 : vector<64x128xf32>
    %38 = arith.mulf %32, %28 : vector<64x128xf32>
    %39 = arith.addf %37, %38 : vector<64x128xf32>
    %40 = vector.broadcast %5 : vector<64x1xf32> to vector<64x128xf32>
    %41 = arith.mulf %40, %39 : vector<64x128xf32>
    %cst_19 = arith.constant dense<0.000000e+00> : vector<128xf32>
    %42 = vector.multi_reduction <add>, %41, %cst_19 [0] : vector<64x128xf32> to vector<128xf32>
    %43 = vector.shape_cast %42 : vector<128xf32> to vector<1x128xf32>
    %44 = vector.broadcast %5 : vector<64x1xf32> to vector<64x128xf32>
    %45 = arith.mulf %44, %29 : vector<64x128xf32>
    %cst_20 = arith.constant dense<0.000000e+00> : vector<128xf32>
    %46 = vector.multi_reduction <add>, %45, %cst_20 [0] : vector<64x128xf32> to vector<128xf32>
    %47 = vector.shape_cast %46 : vector<128xf32> to vector<1x128xf32>
    %48 = vector.broadcast %6 : vector<1x1xf32> to vector<1x128xf32>
    %49 = arith.addf %47, %48 : vector<1x128xf32>
    %c128_i32 = arith.constant 128 : i32
    %50 = arith.muli %arg0, %c128_i32 : i32
    %51 = tpu.iota {dimensions = array<i32: 1>} : vector<1x128xi32>
    %52 = vector.broadcast %50 : i32 to vector<1x128xi32>
    %53 = arith.addi %52, %51 : vector<1x128xi32>
    %c8_i32 = arith.constant 8 : i32
    %54 = vector.broadcast %c8_i32 : i32 to vector<1x128xi32>
    %55 = arith.cmpi slt, %53, %54 : vector<1x128xi32>
    %cst_21 = arith.constant 2.000000e-01 : f32
    %56 = vector.broadcast %cst_21 : f32 to vector<1x128xf32>
    %57 = arith.mulf %43, %56 : vector<1x128xf32>
    %cst_22 = arith.constant 2.000000e+01 : f32
    %58 = vector.broadcast %cst_22 : f32 to vector<1x128xf32>
    %59 = arith.mulf %49, %58 : vector<1x128xf32>
    %60 = arith.select %55, %57, %59 : vector<1x128xi1>, vector<1x128xf32>
    %c0_23 = arith.constant 0 : index
    %c0_24 = arith.constant 0 : index
    %61 = vector.load %arg8[%c0_23, %c0_24] : memref<1x128xf32, #tpu.memory_space<vmem>>, vector<1x128xf32>
    tpu.vector_store %arg8[%c0_23, %c0_24], %60 {strides = array<i32>} : memref<1x128xf32, #tpu.memory_space<vmem>>, vector<1x128xf32>,
    return
  }
  func.func @transform_0(%arg0: i32) -> (i32, i32) {
    %c0_i32 = arith.constant 0 : i32
    %c0_i32_0 = arith.constant 0 : i32
    return %c0_i32, %arg0 : i32, i32
  }
  func.func @transform_1(%arg0: i32) -> (i32, i32) {
    %c0_i32 = arith.constant 0 : i32
    %c0_i32_0 = arith.constant 0 : i32
    %c0_i32_1 = arith.constant 0 : i32
    return %c0_i32, %c0_i32_0 : i32, i32
  }
  func.func @transform_2(%arg0: i32) -> (i32, i32) {
    %c0_i32 = arith.constant 0 : i32
    %c0_i32_0 = arith.constant 0 : i32
    %c0_i32_1 = arith.constant 0 : i32
    return %c0_i32, %c0_i32_0 : i32, i32
  }
  func.func @transform_3(%arg0: i32) -> (i32, i32) {
    %c0_i32 = arith.constant 0 : i32
    %c0_i32_0 = arith.constant 0 : i32
    %c0_i32_1 = arith.constant 0 : i32
    return %c0_i32, %c0_i32_0 : i32, i32
  }
  func.func @transform_4(%arg0: i32) -> (i32, i32) {
    %c0_i32 = arith.constant 0 : i32
    %c0_i32_0 = arith.constant 0 : i32
    %c0_i32_1 = arith.constant 0 : i32
    return %c0_i32, %c0_i32_0 : i32, i32
  }
  func.func @transform_5(%arg0: i32) -> (i32, i32) {
    %c0_i32 = arith.constant 0 : i32
    %c0_i32_0 = arith.constant 0 : i32
    %c0_i32_1 = arith.constant 0 : i32
    return %c0_i32, %c0_i32_0 : i32, i32
  }
  func.func @transform_6(%arg0: i32) -> (i32, i32) {
    %c0_i32 = arith.constant 0 : i32
    %c0_i32_0 = arith.constant 0 : i32
    %c0_i32_1 = arith.constant 0 : i32
    return %c0_i32, %c0_i32_0 : i32, i32
  }
  func.func @transform_7(%arg0: i32) -> (i32, i32) {
    %c0_i32 = arith.constant 0 : i32
    %c0_i32_0 = arith.constant 0 : i32
    return %c0_i32, %arg0 : i32, i32
  }
}

</mosaic_0001>

<bundles_post_ra>
// kernel: tpu_custom_call.1
= control target key start
LH: loop header
LB: loop body
LE: loop exit
PB: predicated region body
PF: predicated region fallthrough
CT: control target
= control target key end

     0   :  { %s1395_s0 = inlined_call_operand.vmem [shape: f32[1,128], index: 0, kind: input, shape index: {}]   ;;  %s1396_s1 = inlined_call_operand.vmem [shape: f32[64,1], index: 1, kind: input, shape index: {}]   ;;  %s1397_s2 = inlined_call_operand.vmem [shape: f32[64,1], index: 2, kind: input, shape index: {}]   ;;  %s1398_s3 = inlined_call_operand.vmem [shape: f32[64,64], index: 3, kind: input, shape index: {}]   ;;  %s1399_s4 = inlined_call_operand.vmem [shape: f32[64,1], index: 4, kind: input, shape index: {}]   ;;  %s1400_s5 = inlined_call_operand.vmem [shape: f32[64,1], index: 5, kind: input, shape index: {}]   ;;  %s1401_s6 = inlined_call_operand.<no memory space> [shape: f32[1,1], index: 6, kind: input, shape index: {}]   ;;  %s1402_s7 = inlined_call_operand.hbm [shape: f32[1,128], index: 7, kind: output, shape index: {}]  }
   0x1   :  { %v12_v0 = vstv %s1401_s6 }
   0x2   :  { %13 = vst [vmem:[#allocation2] sm:$0x1] %v12_v0 }
   0x3   :  { %v38_v1 = vld [vmem:[%s1397_s2] sm:$0xff]  ;;  %v1118_v3 = vmov 0   ;;  %v39_v4 = vld [vmem:[%s1397_s2 + $0x8] sm:$0xff]  ;;  %v33_v6 = vld [vmem:[%s1396_s1 + $0x18] sm:$0xff] }
   0x4   :  { %v30_v2 = vld [vmem:[%s1396_s1] sm:$0xff]  ;;  %1061 = vset.pattern.permute.xlu1 %v1118_v3  ;;  %1060 = vset.pattern.permute.xlu0 %v1118_v3  ;;  %v31_v5 = vld [vmem:[%s1396_s1 + $0x8] sm:$0xff]  ;;  %v32_v7 = vld [vmem:[%s1396_s1 + $0x10] sm:$0xff] }
   0x5   :  { %135 = vperm.xlu1 %1061, %v38_v1   ;;  %81 = vperm.xlu0 %1060, %v30_v2   ;;  %v41_v8 = vld [vmem:[%s1397_s2 + $0x18] sm:$0xff]  ;;  %v40_v9 = vld [vmem:[%s1397_s2 + $0x10] sm:$0xff] }
   0x9   :  { %140 = vperm.xlu1 %1061, %v39_v4   ;;  %86 = vperm.xlu0 %1060, %v31_v5  }
   0xd   :  { %96 = vperm.xlu1 %1061, %v33_v6   ;;  %91 = vperm.xlu0 %1060, %v32_v7  }
   0xe   :  { %14 = vsyncpa [#allocation4], 0  ;;  %v35_v10 = vld [vmem:[%s1396_s1 + $0x28] sm:$0xff]  ;;  %v34_v11 = vld [vmem:[%s1396_s1 + $0x20] sm:$0xff]  ;;  %v71_v18 = vmul.f32 %v30_v2, %v30_v2  ;;  %v72_v19 = vmul.f32 %v31_v5, %v31_v5  ;;  %v74_v20 = vmul.f32 %v33_v6, %v33_v6  ;;  %v73_v21 = vmul.f32 %v32_v7, %v32_v7 }
   0xf   :  { %v43_v12 = vld [vmem:[%s1397_s2 + $0x28] sm:$0xff]  ;;  %v42_v13 = vld [vmem:[%s1397_s2 + $0x20] sm:$0xff]  ;;  %v37_v14 = vld [vmem:[%s1396_s1 + $0x38] sm:$0xff]  ;;  %v76_v22 = vmul.f32 %v35_v10, %v35_v10  ;;  %v75_v23 = vmul.f32 %v34_v11, %v34_v11  ;;  %vm317_vm0 = vcmask 523264  }
  0x10   :  { %v36_v15 = vld [vmem:[%s1396_s1 + $0x30] sm:$0xff]  ;;  %v45_v16 = vld [vmem:[%s1397_s2 + $0x38] sm:$0xff]  ;;  %v78_v24 = vmul.f32 %v37_v14, %v37_v14  ;;  %v55_v26 = vld [vmem:[%s1399_s4 + $0x8] sm:$0xff] }
  0x11   :  { %150 = vperm.xlu1 %1061, %v41_v8   ;;  %145 = vperm.xlu0 %1060, %v40_v9   ;;  %v44_v17 = vld [vmem:[%s1397_s2 + $0x30] sm:$0xff]  ;;  %v77_v25 = vmul.f32 %v36_v15, %v36_v15  ;;  %v54_v27 = vld [vmem:[%s1399_s4] sm:$0xff]  ;;  %v57_v29 = vld [vmem:[%s1399_s4 + $0x18] sm:$0xff] }
  0x12   :  { %v1220_v28 = vld [vmem:[%s1398_s3] sm:$0xff]  ;;  %v56_v30 = vld [vmem:[%s1399_s4 + $0x10] sm:$0xff]  ;;  %v59_v31 = vld [vmem:[%s1399_s4 + $0x28] sm:$0xff] }
  0x13   :  { %934 = vmatprep.mubr.msk.f32.mxu0 %vm317_vm0, %v1220_v28  ;;  %962 = vmatprep.mubr.msk.f32.mxu1 %vm317_vm0, %v1220_v28  ;;  %v58_v32 = vld [vmem:[%s1399_s4 + $0x20] sm:$0xff]  ;;  %v61_v33 = vld [vmem:[%s1399_s4 + $0x38] sm:$0xff]  ;;  %v60_v34 = vld [vmem:[%s1399_s4 + $0x30] sm:$0xff] }
  0x14   :  { %v63_v35 = vld [vmem:[%s1400_s5 + $0x8] sm:$0xff]  ;;  %v62_v36 = vld [vmem:[%s1400_s5] sm:$0xff]  ;;  %v65_v37 = vld [vmem:[%s1400_s5 + $0x18] sm:$0xff] }
  0x15   :  { %106 = vperm.xlu1 %1061, %v35_v10   ;;  %101 = vperm.xlu0 %1060, %v34_v11   ;;  %v64_v38 = vld [vmem:[%s1400_s5 + $0x10] sm:$0xff]  ;;  %v67_v39 = vld [vmem:[%s1400_s5 + $0x28] sm:$0xff]  ;;  %v66_v40 = vld [vmem:[%s1400_s5 + $0x20] sm:$0xff] }
  0x16   :  { %v69_v41 = vld [vmem:[%s1400_s5 + $0x38] sm:$0xff]  ;;  %v68_v42 = vld [vmem:[%s1400_s5 + $0x30] sm:$0xff]  ;;  %v70_v43 = vld [vmem:[#allocation2] sm:$0x1] }
  0x17   :  { %v845_v44 = vld [vmem:[%s1395_s0] ss:$0 sm:$0xff] }
  0x19   :  { %160 = vperm.xlu1 %1061, %v43_v12   ;;  %155 = vperm.xlu0 %1060, %v42_v13  }
  0x1d   :  { %116 = vperm.xlu1 %1061, %v37_v14   ;;  %111 = vperm.xlu0 %1060, %v36_v15  }
  0x21   :  { %170 = vperm.xlu1 %1061, %v45_v16   ;;  %165 = vperm.xlu0 %1060, %v44_v17  }
  0x25   :  { %236 = vperm.xlu1 %1061, %v72_v19   ;;  %231 = vperm.xlu0 %1060, %v71_v18  }
  0x29   :  { %246 = vperm.xlu1 %1061, %v74_v20   ;;  %241 = vperm.xlu0 %1060, %v73_v21  }
  0x2d   :  { %256 = vperm.xlu1 %1061, %v76_v22   ;;  %251 = vperm.xlu0 %1060, %v75_v23  }
  0x31   :  { %266 = vperm.xlu1 %1061, %v78_v24   ;;  %261 = vperm.xlu0 %1060, %v77_v25  }
  0x35   :  { %284 = vperm.xlu1 %1061, %v55_v26   ;;  %279 = vperm.xlu0 %1060, %v54_v27  }
  0x39   :  { %294 = vperm.xlu1 %1061, %v57_v29   ;;  %289 = vperm.xlu0 %1060, %v56_v30  }
  0x3d   :  { %304 = vperm.xlu1 %1061, %v59_v31   ;;  %299 = vperm.xlu0 %1060, %v58_v32  }
  0x41   :  { %314 = vperm.xlu1 %1061, %v61_v33   ;;  %309 = vperm.xlu0 %1060, %v60_v34  }
  0x45   :  { %736 = vperm.xlu1 %1061, %v63_v35   ;;  %731 = vperm.xlu0 %1060, %v62_v36  }
  0x49   :  { %746 = vperm.xlu1 %1061, %v65_v37   ;;  %741 = vperm.xlu0 %1060, %v64_v38  }
  0x4d   :  { %756 = vperm.xlu1 %1061, %v67_v39   ;;  %751 = vperm.xlu0 %1060, %v66_v40  }
  0x51   :  { %766 = vperm.xlu1 %1061, %v69_v41   ;;  %761 = vperm.xlu0 %1060, %v68_v42  }
  0x55   :  { %813 = vperm.xlu0 %1060, %v70_v43  }
  0x84   :  { %v136_v45 = vpop.permute.xlu1 %135  ;;  %v82_v46 = vpop.permute.xlu0 %81 }
  0x85   :  { %v125_v47 = vmul.f32 %v845_v44, %v82_v46 }
  0x87   :  { %v173_v48 = vadd.f32 %v136_v45, %v125_v47 }
  0x88   :  { %v141_v49 = vpop.permute.xlu1 %140  ;;  %v87_v50 = vpop.permute.xlu0 %86 }
  0x89   :  { %1062 = vtanh.f32 %v173_v48  ;;  %v126_v51 = vmul.f32 %v845_v44, %v87_v50 }
  0x8b   :  { %v174_v52 = vadd.f32 %v141_v49, %v126_v51 }
  0x8c   :  { %v97_v53 = vpop.permute.xlu1 %96  ;;  %v92_v54 = vpop.permute.xlu0 %91 }
  0x8d   :  { %1064 = vtanh.f32 %v174_v52  ;;  %v128_v55 = vmul.f32 %v845_v44, %v97_v53  ;;  %v127_v56 = vmul.f32 %v845_v44, %v92_v54 }
  0x90   :  { %v151_v57 = vpop.permute.xlu1 %150  ;;  %v146_v58 = vpop.permute.xlu0 %145 }
  0x91   :  { %v176_v59 = vadd.f32 %v151_v57, %v128_v55  ;;  %v175_v60 = vadd.f32 %v146_v58, %v127_v56 }
  0x93   :  { %v1063_v61 = vpop.eup %1062  ;;  %1066 = vtanh.f32 %v176_v59 }
  0x94   :  { %v1271_v62 = vmul.f32 %v1063_v61, %v1063_v61  ;;  %1068 = vtanh.f32 %v175_v60  ;;  %v107_v63 = vpop.permute.xlu1 %106  ;;  %v102_v0 = vpop.permute.xlu0 %101  ;;  %v213_v43 = vmul.f32 -2.0, %v1063_v61 }
  0x95   :  { %v130_v2 = vmul.f32 %v845_v44, %v107_v63  ;;  %v129_v3 = vmul.f32 %v845_v44, %v102_v0 }
  0x96   :  { %v197_v4 = vsub.f32 1.0, %v1271_v62 }
  0x97   :  { %v1065_v1 = vpop.eup %1064 }
  0x98   :  { %v190_v5 = vmul.f32 %v1065_v1, %v1065_v1  ;;  %v161_v6 = vpop.permute.xlu1 %160  ;;  %v156_v7 = vpop.permute.xlu0 %155  ;;  %v1002_v8 = vpack.c.bf16 %v1065_v1, %v1063_v61  ;;  %v205_v12 = vmul.f32 %v197_v4, %v82_v46  ;;  %v214_v42 = vmul.f32 -2.0, %v1065_v1 }
  0x99   :  { %v178_v9 = vadd.f32 %v161_v6, %v130_v2  ;;  %v177_v10 = vadd.f32 %v156_v7, %v129_v3  ;;  %v221_v47 = vmul.f32 %v213_v43, %v197_v4 }
  0x9a   :  { %v198_v11 = vsub.f32 1.0, %v190_v5  ;;  %1003 = vmatprep.subr.bf16.mxu0 %v1002_v8 }
  0x9b   :  { %1070 = vtanh.f32 %v178_v9  ;;  %1005 = vmatpush3.bf16.msra.mxu0 %v1002_v8 }
  0x9c   :  { %v206_v13 = vmul.f32 %v198_v11, %v87_v50  ;;  %1072 = vtanh.f32 %v177_v10  ;;  %v1274_v14 = vpop.permute.xlu1 %116  ;;  %v1276_v15 = vpop.permute.xlu0 %111  ;;  %v222_v46 = vmul.f32 %v214_v42, %v198_v11  ;;  %v47_v10 = vld [vmem:[%s1398_s3 + $0x8] sm:$0xff] }
  0x9d   :  { %v1067_v16 = vpop.eup %1066  ;;  %v132_v20 = vmul.f32 %v845_v44, %v1274_v14  ;;  %v131_v21 = vmul.f32 %v845_v44, %v1276_v15 }
  0x9e   :  { %v1069_v17 = vpop.eup %1068  ;;  %v1018_v18 = vpack.c.bf16 %v206_v13, %v205_v12  ;;  %v192_v19 = vmul.f32 %v1067_v16, %v1067_v16  ;;  %v216_v50 = vmul.f32 -2.0, %v1067_v16 }
  0x9f   :  { %v1006_v22 = vpack.c.bf16 %v1067_v16, %v1069_v17  ;;  %v191_v23 = vmul.f32 %v1069_v17, %v1069_v17  ;;  %v215_v52 = vmul.f32 -2.0, %v1069_v17  ;;  %v48_v17 = vld [vmem:[%s1398_s3 + $0x10] sm:$0xff] }
  0xa0   :  { %v171_v24 = vpop.permute.xlu1 %170  ;;  %v166_v25 = vpop.permute.xlu0 %165  ;;  %1019 = vmatprep.subr.bf16.mxu1 %v1018_v18  ;;  %v200_v26 = vsub.f32 1.0, %v192_v19 }
  0xa1   :  { %v180_v27 = vadd.f32 %v171_v24, %v132_v20  ;;  %v179_v29 = vadd.f32 %v166_v25, %v131_v21  ;;  %1007 = vmatprep.subr.bf16.mxu0 %v1006_v22  ;;  %1021 = vmatpush3.bf16.msra.mxu1 %v1018_v18  ;;  %v199_v30 = vsub.f32 1.0, %v191_v23 }
  0xa2   :  { %1009 = vmatpush3.bf16.msra.mxu0 %v1006_v22  ;;  %v208_v31 = vmul.f32 %v200_v26, %v97_v53  ;;  %v224_v58 = vmul.f32 %v216_v50, %v200_v26 }
  0xa3   :  { %1074 = vtanh.f32 %v180_v27  ;;  %v207_v32 = vmul.f32 %v199_v30, %v92_v54  ;;  %v223_v59 = vmul.f32 %v215_v52, %v199_v30  ;;  %v51_v30 = vld [vmem:[%s1398_s3 + $0x28] sm:$0xff] }
  0xa4   :  { %1076 = vtanh.f32 %v179_v29  ;;  %v237_v34 = vpop.permute.xlu1 %236  ;;  %v232_v37 = vpop.permute.xlu0 %231 }
  0xa5   :  { %v1071_v33 = vpop.eup %1070  ;;  %v1022_v35 = vpack.c.bf16 %v208_v31, %v207_v32  ;;  %v270_v54 = vmul.f32 %v237_v34, %v222_v46  ;;  %v269_v55 = vmul.f32 %v232_v37, %v221_v47  ;;  %v52_v31 = vld [vmem:[%s1398_s3 + $0x30] sm:$0xff] }
  0xa6   :  { %v1073_v36 = vpop.eup %1072  ;;  %v194_v38 = vmul.f32 %v1071_v33, %v1071_v33  ;;  %v218_v60 = vmul.f32 -2.0, %v1071_v33 }
  0xa7   :  { %1023 = vmatprep.subr.bf16.mxu1 %v1022_v35  ;;  %v1010_v39 = vpack.c.bf16 %v1071_v33, %v1073_v36  ;;  %v193_v40 = vmul.f32 %v1073_v36, %v1073_v36  ;;  %v217_v62 = vmul.f32 -2.0, %v1073_v36  ;;  %v1034_v5 = vpack.c.bf16 %v270_v54, %v269_v55  ;;  %v53_v33 = vld [vmem:[%s1398_s3 + $0x38] sm:$0xff] }
  0xa8   :  { %1025 = vmatpush3.bf16.msra.mxu1 %v1022_v35  ;;  %v202_v41 = vsub.f32 1.0, %v194_v38  ;;  %v247_v48 = vpop.permute.xlu1 %246  ;;  %v242_v51 = vpop.permute.xlu0 %241 }
  0xa9   :  { %1011 = vmatprep.subr.bf16.mxu0 %v1010_v39  ;;  %v201_v44 = vsub.f32 1.0, %v193_v40  ;;  %v272_v2 = vmul.f32 %v247_v48, %v224_v58  ;;  %v271_v3 = vmul.f32 %v242_v51, %v223_v59 }
  0xaa   :  { %1013 = vmatpush3.bf16.msra.mxu0 %v1010_v39  ;;  %v210_v45 = vmul.f32 %v202_v41, %v107_v63  ;;  %v226_v4 = vmul.f32 %v218_v60, %v202_v41 }
  0xab   :  { %v209_v49 = vmul.f32 %v201_v44, %v102_v0  ;;  %v225_v7 = vmul.f32 %v217_v62, %v201_v44  ;;  %v1038_v18 = vpack.c.bf16 %v272_v2, %v271_v3 }
  0xac   :  { %v257_v6 = vpop.permute.xlu1 %256  ;;  %v252_v9 = vpop.permute.xlu0 %251 }
  0xad   :  { %v1075_v53 = vpop.eup %1074  ;;  %v1026_v56 = vpack.c.bf16 %v210_v45, %v209_v49  ;;  %v274_v19 = vmul.f32 %v257_v6, %v226_v4  ;;  %v273_v20 = vmul.f32 %v252_v9, %v225_v7 }
  0xae   :  { %v1077_v57 = vpop.eup %1076  ;;  %v196_v61 = vmul.f32 %v1075_v53, %v1075_v53  ;;  %v220_v12 = vmul.f32 -2.0, %v1075_v53 }
  0xaf   :  { %1027 = vmatprep.subr.bf16.mxu1 %v1026_v56  ;;  %v195_v1 = vmul.f32 %v1077_v57, %v1077_v57  ;;  %v1014_v63 = vpack.c.bf16 %v1075_v53, %v1077_v57  ;;  %v219_v13 = vmul.f32 -2.0, %v1077_v57  ;;  %v1042_v26 = vpack.c.bf16 %v274_v19, %v273_v20 }
  0xb0   :  { %1029 = vmatpush3.bf16.msra.mxu1 %v1026_v56  ;;  %v204_v0 = vsub.f32 1.0, %v196_v61  ;;  %v267_v24 = vpop.permute.xlu1 %266  ;;  %v262_v25 = vpop.permute.xlu0 %261 }
  0xb1   :  { %v203_v8 = vsub.f32 1.0, %v195_v1  ;;  %1015 = vmatprep.subr.bf16.mxu0 %v1014_v63 }
  0xb2   :  { %1017 = vmatpush3.bf16.msra.mxu0 %v1014_v63  ;;  %v212_v11 = vmul.f32 %v204_v0, %v1274_v14  ;;  %v228_v21 = vmul.f32 %v220_v12, %v204_v0  ;;  %v49_v14 = vld [vmem:[%s1398_s3 + $0x18] sm:$0xff] }
  0xb3   :  { %1035 = vmatprep.subr.bf16.mxu0 %v1034_v5  ;;  %v211_v16 = vmul.f32 %v203_v8, %v1276_v15  ;;  %v227_v22 = vmul.f32 %v219_v13, %v203_v8  ;;  %v50_v15 = vld [vmem:[%s1398_s3 + $0x20] sm:$0xff]  ;;  %s1119_s3 = smov [#allocation3]  }
  0xb4   :  { %v276_v27 = vmul.f32 %v267_v24, %v228_v21  ;;  %v285_v34 = vpop.permute.xlu1 %284  ;;  %s837_s29 = sshll.u32 %s1119_s3, 4  ;;  %s838_s29 = int_to_ptr.vmem [resolvable:$true] %s837_s29 }
  0xb5   :  { %935 = vmatmul.mubr.msk.f32.vlgmr.msra.gmra.mrb[0].mxu0 %vm317_vm0, %v47_v10  ;;  %v1030_v23 = vpack.c.bf16 %v212_v11, %v211_v16  ;;  %v275_v29 = vmul.f32 %v262_v25, %v227_v22  ;;  %s1094_s30 = scalar_lea.vmem %s838_s29, 16  ;;  %s1098_s8 = scalar_lea.vmem %s838_s29, 32 }
  0xb6   :  { %1037 = vmatpush3.bf16.msra.mxu0 %v1034_v5  ;;  %937 = vmatprep.mubr.msk.f32.mxu0 %vm317_vm0, %v48_v17  ;;  %p1095_p0 = scmp.ne.s32.totalorder %s838_s29, %s1094_s30  ;;  %p1099_p1 = scmp.lt.s32.totalorder %s838_s29, %s838_s29 }
  0xb7   :  { %1031 = vmatprep.subr.bf16.mxu1 %v1030_v23  ;;  %1039 = vmatprep.subr.bf16.mxu0 %v1038_v18  ;;  %v1046_v32 = vpack.c.bf16 %v276_v27, %v275_v29  ;;  %p1100_p2 = scmp.lt.s32.totalorder %s1098_s8, %s1094_s30 }
  0xb8   :  { %1033 = vmatpush3.bf16.msra.mxu1 %v1030_v23  ;;  %v295_v36 = vpop.permute.xlu1 %294 }
  0xb9   :  { %938 = vmatmul.mubr.msk.f32.gmra.mrb[2].mxu0 %vm317_vm0, %v49_v14  ;;  %1050 = vmatprep.subr.bf16.mxu1 %v1034_v5  ;;  %p1101_p3 = por %p1100_p2, %p1099_p1 }
  0xba   :  { %1041 = vmatpush3.bf16.msra.mxu0 %v1038_v18  ;;  %940 = vmatprep.mubr.msk.f32.mxu0 %vm317_vm0, %v50_v15 }
  0xbb   :  { %1043 = vmatprep.subr.bf16.mxu0 %v1042_v26  ;;  %963 = vmatmul.mubr.msk.f32.vlgmr.msra.gmra.mrb[0].mxu1 %vm317_vm0, %v47_v10  ;;  %p1102_p4 = pnand %p1101_p3, %p1095_p0 }
  0xbc   :  { %1054 = vmatpush3.bf16.msra.mxu1 %v1034_v5  ;;  %965 = vmatprep.mubr.msk.f32.mxu1 %vm317_vm0, %v48_v17  ;;  %v305_v39 = vpop.permute.xlu1 %304 }
  0xbd   :  { %941 = vmatmul.mubr.msk.f32.gmra.mrb[4].mxu0 %vm317_vm0, %v51_v30  ;;  %1051 = vmatprep.subr.bf16.mxu1 %v1038_v18 }
  0xbe   :  { %1045 = vmatpush3.bf16.msra.mxu0 %v1042_v26  ;;  %943 = vmatprep.mubr.msk.f32.mxu0 %vm317_vm0, %v52_v31 }
  0xbf   :  { %1047 = vmatprep.subr.bf16.mxu0 %v1046_v32  ;;  %966 = vmatmul.mubr.msk.f32.gmra.mrb[2].mxu1 %vm317_vm0, %v49_v14 }
  0xc0   :  { %1055 = vmatpush3.bf16.msra.mxu1 %v1038_v18  ;;  %968 = vmatprep.mubr.msk.f32.mxu1 %vm317_vm0, %v50_v15  ;;  %v315_v49 = vpop.permute.xlu1 %314 }
  0xc1   :  { %944 = vmatmul.mubr.msk.f32.gmra.mrb[6].mxu0 %vm317_vm0, %v53_v33  ;;  %1052 = vmatprep.subr.bf16.mxu1 %v1042_v26 }
  0xc2   :  { %1049 = vmatpush3.bf16.msra.mxu0 %v1046_v32  ;;  %990 = vmatprep.mubr.msk.f32.mxu0 %vm317_vm0, %v1220_v28  ;;  %v280_v28 = vpop.permute.xlu0 %279 }
  0xc3   :  { %969 = vmatmul.mubr.msk.f32.gmra.mrb[4].mxu1 %vm317_vm0, %v51_v30 }
  0xc4   :  { %1056 = vmatpush3.bf16.msra.mxu1 %v1042_v26  ;;  %971 = vmatprep.mubr.msk.f32.mxu1 %vm317_vm0, %v52_v31  ;;  %v1332_v60 = vpop.permute.xlu1 %736 }
  0xc5   :  { %1053 = vmatprep.subr.bf16.mxu1 %v1046_v32  ;;  %991 = vmatmul.mubr.msk.f32.vlgmr.msra.gmra.mrb[8].mxu0 %vm317_vm0, %v47_v10 }
  0xc6   :  { %993 = vmatprep.mubr.msk.f32.mxu0 %vm317_vm0, %v48_v17  ;;  %v290_v35 = vpop.permute.xlu0 %289 }
  0xc7   :  { %972 = vmatmul.mubr.msk.f32.gmra.mrb[6].mxu1 %vm317_vm0, %v53_v33 }
  0xc8   :  { %1057 = vmatpush3.bf16.msra.mxu1 %v1046_v32  ;;  %996 = vmatprep.mubr.msk.f32.mxu1 %vm317_vm0, %v50_v15 }
  0xc9   :  { %994 = vmatmul.mubr.msk.f32.gmra.mrb[10].mxu0 %vm317_vm0, %v49_v14 }
  0xca   :  { %v300_v37 = vpop.permute.xlu0 %299 }
  0xcb   :  { %997 = vmatmul.mubr.msk.f32.vlgmr.msra.gmra.mrb[8].mxu1 %vm317_vm0, %v51_v30 }
  0xcc   :  { %999 = vmatprep.mubr.msk.f32.mxu1 %vm317_vm0, %v52_v31 }
  0xce   :  { %v310_v46 = vpop.permute.xlu0 %309 }
  0xcf   :  { %1000 = vmatmul.mubr.msk.f32.gmra.mrb[10].mxu1 %vm317_vm0, %v53_v33 }
  0xd2   :  { %v1330_v57 = vpop.permute.xlu0 %731 }
  0xd6   :  { %v1342_v16 = vpop.permute.xlu0 %741 }
 0x188   :  { %v936_v38 = vpop.f32.mrb[0].mxu0 }
 0x189   :  { %v414_v40 = vadd.f32 %v936_v38, %v285_v34  ;;  %v408_v41 = vpop.f32.mrb[1].mxu0 }
 0x18a   :  { %v409_v42 = vadd.f32 %v408_v41, %v280_v28 }
 0x18b   :  { %1078 = vtanh.f32 %v414_v40 }
 0x18c   :  { %1080 = vtanh.f32 %v409_v42  ;;  %v939_v43 = vpop.f32.mrb[2].mxu0 }
 0x18d   :  { %v424_v44 = vadd.f32 %v939_v43, %v295_v36  ;;  %v418_v45 = vpop.f32.mrb[3].mxu0 }
 0x18e   :  { %v419_v47 = vadd.f32 %v418_v45, %v290_v35  ;;  %v964_v48 = vpop.f32.mrb[0].mxu1 }
 0x18f   :  { %1082 = vtanh.f32 %v424_v44  ;;  %v513_v50 = vpop.f32.mrb[1].mxu1 }
 0x190   :  { %1084 = vtanh.f32 %v419_v47  ;;  %v942_v51 = vpop.f32.mrb[4].mxu0 }
 0x191   :  { %v434_v52 = vadd.f32 %v942_v51, %v305_v39  ;;  %v428_v53 = vpop.f32.mrb[5].mxu0 }
 0x192   :  { %v429_v54 = vadd.f32 %v428_v53, %v300_v37  ;;  %v1326_v55 = vpop.f32.mrb[2].mxu1 }
 0x193   :  { %1086 = vtanh.f32 %v434_v52  ;;  %v1328_v56 = vpop.f32.mrb[3].mxu1 }
 0x194   :  { %1088 = vtanh.f32 %v429_v54  ;;  %v945_v58 = vpop.f32.mrb[6].mxu0 }
 0x195   :  { %v1079_v59 = vpop.eup %1078  ;;  %v444_v61 = vadd.f32 %v945_v58, %v315_v49  ;;  %v438_v62 = vpop.f32.mrb[7].mxu0 }
 0x196   :  { %v1081_v1 = vpop.eup %1080  ;;  %v791_v63 = vmul.f32 %v1079_v59, %v1332_v60  ;;  %v666_v2 = vmul.f32 %v1079_v59, %v1079_v59  ;;  %v439_v3 = vadd.f32 %v438_v62, %v310_v46  ;;  %v1335_v4 = vpop.f32.mrb[4].mxu1  ;;  %v690_v18 = vmul.f32 -2.0, %v1079_v59 }
 0x197   :  { %v790_v0 = vmul.f32 %v1081_v1, %v1330_v57  ;;  %1090 = vtanh.f32 %v444_v61  ;;  %v665_v5 = vmul.f32 %v1081_v1, %v1081_v1  ;;  %v1338_v6 = vpop.f32.mrb[5].mxu1  ;;  %v689_v14 = vmul.f32 -2.0, %v1081_v1 }
 0x198   :  { %v674_v7 = vsub.f32 1.0, %v666_v2  ;;  %1092 = vtanh.f32 %v439_v3  ;;  %v992_v8 = vpop.f32.mrb[8].mxu0 }
 0x199   :  { %v1340_v9 = vpop.eup %1082  ;;  %v673_v10 = vsub.f32 1.0, %v665_v5  ;;  %v618_v11 = vpop.f32.mrb[9].mxu0  ;;  %v798_v12 = vadd.f32 %v791_v63, %v790_v0 }
 0x19a   :  { %v1085_v13 = vpop.eup %1084  ;;  %v682_v17 = vmul.f32 %v964_v48, %v674_v7  ;;  %v668_v19 = vmul.f32 %v1340_v9, %v1340_v9  ;;  %v714_v20 = vmul.f32 %v992_v8, %v674_v7  ;;  %v1346_v21 = vpop.f32.mrb[6].mxu1  ;;  %v692_v32 = vmul.f32 -2.0, %v1340_v9 }
 0x19b   :  { %v792_v22 = vmul.f32 %v1085_v13, %v1342_v16  ;;  %v681_v23 = vmul.f32 %v673_v10, %v513_v50  ;;  %v667_v15 = vmul.f32 %v1085_v13, %v1085_v13  ;;  %v1349_v24 = vpop.f32.mrb[7].mxu1  ;;  %v713_v27 = vmul.f32 %v673_v10, %v618_v11 }
 0x19c   :  { %v698_v25 = vmul.f32 %v690_v18, %v682_v17  ;;  %v676_v26 = vsub.f32 1.0, %v668_v19  ;;  %v995_v29 = vpop.f32.mrb[10].mxu0  ;;  %v691_v38 = vmul.f32 -2.0, %v1085_v13 }
 0x19d   :  { %v1351_v30 = vpop.eup %1086  ;;  %v697_v31 = vmul.f32 %v689_v14, %v681_v23  ;;  %v675_v33 = vsub.f32 1.0, %v667_v15  ;;  %v628_v28 = vpop.f32.mrb[11].mxu0  ;;  %v1354_v34 = vadd.f32 %v798_v12, %v792_v22 }
 0x19e   :  { %v1089_v35 = vpop.eup %1088  ;;  %v706_v36 = vmul.f32 %v964_v48, %v698_v25  ;;  %v684_v37 = vmul.f32 %v1326_v55, %v676_v26  ;;  %v670_v39 = vmul.f32 %v1351_v30, %v1351_v30  ;;  %v998_v40 = vpop.f32.mrb[8].mxu1  ;;  %v694_v43 = vmul.f32 -2.0, %v1351_v30 }
 0x19f   :  { %v705_v41 = vmul.f32 %v697_v31, %v513_v50  ;;  %v683_v42 = vmul.f32 %v675_v33, %v1328_v56  ;;  %v669_v44 = vmul.f32 %v1089_v35, %v1089_v35  ;;  %v638_v45 = vpop.f32.mrb[9].mxu1  ;;  %v716_v51 = vmul.f32 %v995_v29, %v676_v26  ;;  %v747_v12 = vpop.permute.xlu1 %746 }
 0x1a0   :  { %v700_v46 = vmul.f32 %v692_v32, %v684_v37  ;;  %v722_v47 = vadd.f32 %v714_v20, %v706_v36  ;;  %v678_v49 = vsub.f32 1.0, %v670_v39  ;;  %v715_v58 = vmul.f32 %v675_v33, %v628_v28  ;;  %v752_v22 = vpop.permute.xlu0 %751 }
 0x1a1   :  { %v1361_v52 = vpop.eup %1090  ;;  %v699_v48 = vmul.f32 %v691_v38, %v683_v42  ;;  %v721_v53 = vadd.f32 %v713_v27, %v705_v41  ;;  %v677_v54 = vsub.f32 1.0, %v669_v44  ;;  %v693_v5 = vmul.f32 -2.0, %v1089_v35 }
 0x1a2   :  { %v1093_v59 = vpop.eup %1092  ;;  %v708_v61 = vmul.f32 %v1326_v55, %v700_v46  ;;  %v770_v50 = vmul.f32 %v1332_v60, %v722_v47  ;;  %v686_v62 = vmul.f32 %v1335_v4, %v678_v49  ;;  %v672_v1 = vmul.f32 %v1361_v52, %v1361_v52  ;;  %v1001_v63 = vpop.f32.mrb[10].mxu1 }
 0x1a3   :  { %v707_v2 = vmul.f32 %v699_v48, %v1328_v56  ;;  %v769_v3 = vmul.f32 %v1330_v57, %v721_v53  ;;  %v685_v0 = vmul.f32 %v677_v54, %v1338_v6  ;;  %v648_v7 = vpop.f32.mrb[11].mxu1  ;;  %v671_v55 = vmul.f32 %v1093_v59, %v1093_v59 }
 0x1a4   :  { %v702_v8 = vmul.f32 %v694_v43, %v686_v62  ;;  %v724_v10 = vadd.f32 %v716_v51, %v708_v61  ;;  %v680_v11 = vsub.f32 1.0, %v672_v1  ;;  %v696_v18 = vmul.f32 -2.0, %v1361_v52  ;;  %v762_v44 = vpop.permute.xlu0 %761 }
 0x1a5   :  { %v777_v60 = vadd.f32 %v770_v50, %v769_v3  ;;  %v701_v13 = vmul.f32 %v693_v5, %v685_v0  ;;  %v723_v17 = vadd.f32 %v715_v58, %v707_v2  ;;  %v679_v20 = vsub.f32 1.0, %v671_v55 }
 0x1a6   :  { %v710_v19 = vmul.f32 %v1335_v4, %v702_v8  ;;  %v688_v56 = vmul.f32 %v1346_v21, %v680_v11  ;;  %v695_v57 = vmul.f32 -2.0, %v1093_v59  ;;  %v718_v15 = vmul.f32 %v998_v40, %v678_v49 }
 0x1a7   :  { %v709_v23 = vmul.f32 %v701_v13, %v1338_v6  ;;  %v771_v14 = vmul.f32 %v1342_v16, %v723_v17  ;;  %v717_v25 = vmul.f32 %v677_v54, %v638_v45  ;;  %v687_v27 = vmul.f32 %v679_v20, %v1349_v24  ;;  %v757_v6 = vpop.permute.xlu1 %756 }
 0x1a8   :  { %v704_v26 = vmul.f32 %v696_v18, %v688_v56  ;;  %v720_v29 = vmul.f32 %v1001_v63, %v680_v11  ;;  %v719_v31 = vmul.f32 %v679_v20, %v648_v7  ;;  %v772_v32 = vmul.f32 %v747_v12, %v724_v10  ;;  %v814_v10 = vpop.permute.xlu0 %813 }
 0x1a9   :  { %v778_v33 = vadd.f32 %v777_v60, %v771_v14  ;;  %v726_v28 = vadd.f32 %v718_v15, %v710_v19  ;;  %v725_v4 = vadd.f32 %v717_v25, %v709_v23  ;;  %v703_v37 = vmul.f32 %v695_v57, %v687_v27 }
 0x1aa   :  { %v712_v36 = vmul.f32 %v1346_v21, %v704_v26  ;;  %v793_v38 = vmul.f32 %v1340_v9, %v747_v12  ;;  %v794_v39 = vmul.f32 %v1089_v35, %v752_v22  ;;  %v795_v49 = vmul.f32 %v1351_v30, %v757_v6 }
 0x1ab   :  { %v773_v41 = vmul.f32 %v752_v22, %v725_v4  ;;  %v779_v16 = vadd.f32 %v778_v33, %v772_v32  ;;  %v711_v40 = vmul.f32 %v703_v37, %v1349_v24  ;;  %v774_v45 = vmul.f32 %v757_v6, %v726_v28  ;;  %v767_v35 = vpop.permute.xlu1 %766 }
 0x1ac   :  { %v728_v42 = vadd.f32 %v720_v29, %v712_v36  ;;  %v800_v43 = vadd.f32 %v1354_v34, %v793_v38  ;;  %v796_v51 = vmul.f32 %v1093_v59, %v762_v44  ;;  %v797_v61 = vmul.f32 %v1361_v52, %v767_v35 }
 0x1ad   :  { %v780_v46 = vadd.f32 %v779_v16, %v773_v41  ;;  %v727_v47 = vadd.f32 %v719_v31, %v711_v40  ;;  %v816_v50 = vlaneseq }
 0x1ae   :  { %v801_v21 = vadd.f32 %v800_v43, %v794_v39  ;;  %v776_v54 = vmul.f32 %v767_v35, %v728_v42 }
 0x1af   :  { %v781_v48 = vadd.f32 %v780_v46, %v774_v45  ;;  %v775_v53 = vmul.f32 %v762_v44, %v727_v47  ;;  %v817_v2 = vshrl.u32 %v816_v50, 7  ;;  %v823_v12 = vand.u32 127, %v816_v50 }
 0x1b0   :  { %v802_v9 = vadd.f32 %v801_v21, %v795_v49 }
 0x1b1   :  { %v782_v58 = vadd.f32 %v781_v48, %v775_v53  ;;  %v818_v5 = vsub.s32 0, %v817_v2  ;;  %vm826_vm1 = vcmp.lt.s32.totalorder %v823_v12, 8 }
 0x1b2   :  { %v803_v24 = vadd.f32 %v802_v9, %v796_v51 }
 0x1b3   :  { %v783_v62 = vadd.f32 %v782_v58, %v776_v54  ;;  %v819_v60 = vrot.slane %v814_v10, %v818_v5 }
 0x1b4   :  { %v804_v34 = vadd.f32 %v803_v24, %v797_v61 }
 0x1b5   :  { %v784_v1 = vrot.slane %v783_v62, 4 }
 0x1b6   :  { %v805_v63 = vrot.slane %v804_v34, 4 }
 0x1b7   :  { %v785_v3 = vadd.f32 %v784_v1, %v783_v62 }
 0x1b8   :  { %v806_v0 = vadd.f32 %v805_v63, %v804_v34 }
 0x1b9   :  { %v786_v30 = vrot.slane %v785_v3, 2 }
 0x1ba   :  { %v807_v59 = vrot.slane %v806_v0, 2 }
 0x1bb   :  { %v787_v7 = vadd.f32 %v786_v30, %v785_v3 }
 0x1bc   :  { %v808_v8 = vadd.f32 %v807_v59, %v806_v0 }
 0x1bd   :  { %v788_v11 = vrot.slane %v787_v7, 1 }
 0x1be   :  { %v809_v55 = vrot.slane %v808_v8, 1 }
 0x1bf   :  { %v789_v52 = vadd.f32 %v788_v11, %v787_v7 }
 0x1c0   :  { %v810_v13 = vadd.f32 %v809_v55, %v808_v8 }
 0x1c1   :  { %v827_v18 = vmul.f32 0.2, %v789_v52 }
 0x1c2   :  { %v820_v17 = vadd.f32 %v819_v60, %v810_v13 }
 0x1c4   :  { %v828_v19 = vmul.f32 20.0, %v820_v17 }
 0x1c6   :  { %v829_v56 = vsel %vm826_vm1, %v827_v18, %v828_v19 }
 0x1c7   :  { %830 = vst [vmem:[#allocation3] sm:$0x1] %v829_v56 }
 0x1c8   :  { %1105 = shalt.err (!%p1102_p4)
}
 0x1c9   :  { %s1106_s4 = scalar_lea.hbm %s1402_s7, 16 }
 0x1ca   :  { %p1107_p5 = scmp.ne.s32.totalorder %s1402_s7, %s1106_s4  ;;  %p1110_p6 = scmp.lt.u32.totalorder %s1106_s4, %s1402_s7 }
 0x1cc   :  { %p1112_p7 = pnand %p1110_p6, %p1107_p5 }
 0x1ce   :  { %1115 = shalt.err (!%p1112_p7)
}
 0x1cf   :  { %840 = dma.vmem_to_hbm [thread:$0]  %s838_s29, 16, %s1402_s7, [#allocation4]  }
 0x1d0   :  { %1116 = dma.done.wait [#allocation4], 16  }
 0x1d1   :  { %1117 = vsyncadd [#allocation4], 4294967280 }
 0x1d2   :  { %844 = vsyncpa [#allocation4], 1 }

</bundles_post_ra>
